<compile_context>
chip_gen: v7x
topology: tpu7x:2x2x1
jax: 0.10.0
libtpu: 0.0.40
codegen_flags: <defaults>
</compile_context>

<pallas_src>
import functools

import jax
import jax.numpy as jnp
from jax.experimental import pallas as pl
from jax.experimental.pallas import tpu as pltpu

_SUBLANE = 8  # f32 sublane count


def _round_up(n, m):
    return ((n + m - 1) // m) * m


def _pdense_kernel(x_ref, w1_ref, b1_ref, w2_ref, b2_ref,
                   logits_ref, prob_ref, *, matmul_dtype):
    # Cast activation / weights to the MXU dtype in-register (no HBM pre-pass).
    x = x_ref[...].astype(matmul_dtype)      # [TB, F]
    w1 = w1_ref[...].astype(matmul_dtype)    # [F, H]  (tiny, VMEM-resident)
    w2 = w2_ref[...].astype(matmul_dtype)    # [H, O]
    b1 = b1_ref[...]                         # [1, H]  f32
    b2 = b2_ref[...]                         # [1, O]  f32

    # linear1 (MXU, f32 accumulation) + bias + LeakyReLU(0.2) in f32 on the VPU.
    h = jnp.dot(x, w1, preferred_element_type=jnp.float32) + b1
    h = jnp.where(h > 0, h, 0.2 * h)

    # linear2 -> logits.  Only the true O class columns exist (no padded lanes,
    # so no masking is needed and output writeback is minimal).
    logits = jnp.dot(h.astype(matmul_dtype), w2,
                     preferred_element_type=jnp.float32) + b2
    logits_ref[...] = logits.astype(logits_ref.dtype)

    # Numerically stable softmax over the class dim.
    m = jnp.max(logits, axis=-1, keepdims=True)
    e = jnp.exp(logits - m)
    denom = jnp.sum(e, axis=-1, keepdims=True)
    inv = pl.reciprocal(denom, approx=True)   # EUP slot (essentially free)
    inv = inv * (2.0 - denom * inv)           # one Newton step -> ~f32-exact
    prob_ref[...] = (e * inv).astype(prob_ref.dtype)


@functools.partial(jax.jit, static_argnames=("matmul_dtype", "block_b"))
def pdense_forward(x, w1, b1, w2, b2, *,
                   matmul_dtype=jnp.bfloat16, block_b=2048):
    """PDense forward pass.

    x:  [B, F_in]; w1: [F_in, H]; b1: [H]; w2: [H, O]; b2: [O]  (f32 params).
    Returns (logits [B, O], softmax(logits, axis=1) [B, O]) in f32.
    matmul_dtype: dtype fed to the MXU (bf16 default); accumulation is f32.
    block_b: max batch-tile rows per grid step.
    """
    B, F_in = x.shape
    H = w1.shape[1]
    O = w2.shape[1]
    f32 = jnp.float32

    # Batch tile: as big as block_b, but capped near ceil(B/2) so the grid has
    # >= 2 tiles whenever B allows it (v7x megacore sharding).  TB is a sublane
    # multiple; uneven last tiles are handled by Pallas (OOB rows are don't-care
    # on read, dropped on write).
    half = _round_up(max(1, -(-B // 2)), _SUBLANE)
    TB = max(_SUBLANE, min(_round_up(block_b, _SUBLANE), half))
    grid = (pl.cdiv(B, TB),)

    b1r = b1.reshape(1, H)
    b2r = b2.reshape(1, O)

    kernel = functools.partial(_pdense_kernel, matmul_dtype=matmul_dtype)

    logits, prob = pl.pallas_call(
        kernel,
        out_shape=(jax.ShapeDtypeStruct((B, O), f32),
                   jax.ShapeDtypeStruct((B, O), f32)),
        grid=grid,
        in_specs=[
            pl.BlockSpec((TB, F_in), lambda i: (i, 0)),   # x streams over batch
            pl.BlockSpec((F_in, H), lambda i: (0, 0)),    # weights/biases stay
            pl.BlockSpec((1, H), lambda i: (0, 0)),       # VMEM-resident
            pl.BlockSpec((H, O), lambda i: (0, 0)),
            pl.BlockSpec((1, O), lambda i: (0, 0)),
        ],
        out_specs=(pl.BlockSpec((TB, O), lambda i: (i, 0)),
                   pl.BlockSpec((TB, O), lambda i: (i, 0))),
        compiler_params=pltpu.CompilerParams(
            dimension_semantics=("parallel",),   # batch tiles split across TCs
        ),
    )(x, w1, b1r, w2, b2r)

    return logits, prob


if __name__ == "__main__":
    batch, input_size, hidden_size, output_size = 8, 32, 64, 16

    key = jax.random.PRNGKey(0)
    kx, k1, k2 = jax.random.split(key, 3)

    x = jax.random.normal(kx, (batch, input_size), dtype=jnp.float32)
    # weight_init(mean=0, std=0.02): weights ~ N(0, 0.02), biases zero.
    w1 = 0.02 * jax.random.normal(k1, (input_size, hidden_size), dtype=jnp.float32)
    b1 = jnp.zeros((hidden_size,), dtype=jnp.float32)
    w2 = 0.02 * jax.random.normal(k2, (hidden_size, output_size), dtype=jnp.float32)
    b2 = jnp.zeros((output_size,), dtype=jnp.float32)

    def ref(x_, w1_, b1_, w2_, b2_):
        h = x_ @ w1_ + b1_
        h = jnp.where(h > 0, h, 0.2 * h)
        logits = h @ w2_ + b2_
        return logits, jax.nn.softmax(logits, axis=1)

    logits_ref, prob_ref = ref(x, w1, b1, w2, b2)

    # Exact-semantics path (f32 MXU operands) — tight tolerances.
    logits_f32, prob_f32 = pdense_forward(x, w1, b1, w2, b2,
                                          matmul_dtype=jnp.float32)
    jax.block_until_ready((logits_f32, prob_f32))
    assert jnp.allclose(logits_f32, logits_ref, atol=1e-5, rtol=1e-5)
    assert jnp.allclose(prob_f32, prob_ref, atol=1e-5, rtol=1e-5)
    assert jnp.allclose(jnp.sum(prob_f32, axis=1), 1.0, atol=1e-5)

    # Default fast path (bf16 MXU operands, f32 accumulate / elementwise).
    logits_bf, prob_bf = pdense_forward(x, w1, b1, w2, b2)
    jax.block_until_ready((logits_bf, prob_bf))
    assert jnp.allclose(logits_bf, logits_ref, atol=1e-2, rtol=1e-2)
    assert jnp.allclose(prob_bf, prob_ref, atol=1e-2, rtol=1e-2)
    assert jnp.allclose(jnp.sum(prob_bf, axis=1), 1.0, atol=1e-4)

    # Multi-tile grid with a partial last tile (B not a multiple of the tile).
    B2 = 200
    x2 = jax.random.normal(jax.random.PRNGKey(1), (B2, input_size),
                           dtype=jnp.float32)
    l2_ref, p2_ref = ref(x2, w1, b1, w2, b2)

    logits2, prob2 = pdense_forward(x2, w1, b1, w2, b2,
                                    matmul_dtype=jnp.float32, block_b=64)
    jax.block_until_ready((logits2, prob2))
    assert jnp.allclose(logits2, l2_ref, atol=1e-5, rtol=1e-5)
    assert jnp.allclose(prob2, p2_ref, atol=1e-5, rtol=1e-5)
    assert jnp.allclose(jnp.sum(prob2, axis=1), 1.0, atol=1e-5)

    # Default block_b: TB is capped at ~ceil(B/2) -> 2 tiles (v7x two-TC path),
    # second tile partial.
    logits3, prob3 = pdense_forward(x2, w1, b1, w2, b2)
    jax.block_until_ready((logits3, prob3))
    assert jnp.allclose(logits3, l2_ref, atol=1e-2, rtol=1e-2)
    assert jnp.allclose(prob3, p2_ref, atol=1e-2, rtol=1e-2)
    assert jnp.allclose(jnp.sum(prob3, axis=1), 1.0, atol=1e-4)

    print("KERNEL_OK")
</pallas_src>

<mosaic_0001>
module attributes {stable_mosaic.version = 11 : i64} {
  func.func @_pdense_kernel(%arg0: i32, %arg1: memref<8x32xf32, #tpu.memory_space<vmem>>, %arg2: memref<32x64xf32, #tpu.memory_space<vmem>>, %arg3: memref<1x64xf32, #tpu.memory_space<vmem>>, %arg4: memref<64x16xf32, #tpu.memory_space<vmem>>, %arg5: memref<1x16xf32, #tpu.memory_space<vmem>>, %arg6: memref<8x16xf32, #tpu.memory_space<vmem>>, %arg7: memref<8x16xf32, #tpu.memory_space<vmem>>) attributes {dimension_semantics = [#tpu.dimension_semantics<parallel>], iteration_bounds = array<i64: 1>, scalar_prefetch = 0 : i64, scratch_operands = 0 : i64, tpu.core_type = #tpu.core_type<tc>, window_params = [{transform_indices = @transform_0, window_bounds = array<i64: 8, 32>}, {pipeline_mode = #tpu.pipeline_mode<synchronous>, transform_indices = @transform_1, window_bounds = array<i64: 32, 64>}, {pipeline_mode = #tpu.pipeline_mode<synchronous>, transform_indices = @transform_2, window_bounds = array<i64: 1, 64>}, {pipeline_mode = #tpu.pipeline_mode<synchronous>, transform_indices = @transform_3, window_bounds = array<i64: 64, 16>}, {pipeline_mode = #tpu.pipeline_mode<synchronous>, transform_indices = @transform_4, window_bounds = array<i64: 1, 16>}, {transform_indices = @transform_5, window_bounds = array<i64: 8, 16>}, {transform_indices = @transform_6, window_bounds = array<i64: 8, 16>}]} {
    %c0 = arith.constant 0 : index
    %c0_0 = arith.constant 0 : index
    %0 = vector.load %arg1[%c0, %c0_0] : memref<8x32xf32, #tpu.memory_space<vmem>>, vector<8x32xf32>
    %c0_1 = arith.constant 0 : index
    %c0_2 = arith.constant 0 : index
    %1 = vector.load %arg2[%c0_1, %c0_2] : memref<32x64xf32, #tpu.memory_space<vmem>>, vector<32x64xf32>
    %c0_3 = arith.constant 0 : index
    %c0_4 = arith.constant 0 : index
    %2 = vector.load %arg4[%c0_3, %c0_4] : memref<64x16xf32, #tpu.memory_space<vmem>>, vector<64x16xf32>
    %c0_5 = arith.constant 0 : index
    %c0_6 = arith.constant 0 : index
    %3 = vector.load %arg3[%c0_5, %c0_6] : memref<1x64xf32, #tpu.memory_space<vmem>>, vector<1x64xf32>
    %c0_7 = arith.constant 0 : index
    %c0_8 = arith.constant 0 : index
    %4 = vector.load %arg5[%c0_7, %c0_8] : memref<1x16xf32, #tpu.memory_space<vmem>>, vector<1x16xf32>
    %cst = arith.constant dense<0.000000e+00> : vector<8x64xf32>
    %5 = tpu.matmul %0, %1, %cst {dimension_numbers = #tpu.dot_dimension_numbers<[1], [0], [0], [1], [0, 0, 1, 1], [], []>} : vector<8x32xf32>, vector<32x64xf32>, vector<8x64xf32> -> vector<8x64xf32>
    %6 = vector.broadcast %3 : vector<1x64xf32> to vector<8x64xf32>
    %7 = arith.addf %5, %6 : vector<8x64xf32>
    %cst_9 = arith.constant 0.000000e+00 : f32
    %8 = vector.broadcast %cst_9 : f32 to vector<8x64xf32>
    %9 = arith.cmpf ogt, %7, %8 : vector<8x64xf32>
    %cst_10 = arith.constant 2.000000e-01 : f32
    %10 = vector.broadcast %cst_10 : f32 to vector<8x64xf32>
    %11 = arith.mulf %10, %7 : vector<8x64xf32>
    %12 = arith.select %9, %7, %11 : vector<8x64xi1>, vector<8x64xf32>
    %cst_11 = arith.constant dense<0.000000e+00> : vector<8x16xf32>
    %13 = tpu.matmul %12, %2, %cst_11 {dimension_numbers = #tpu.dot_dimension_numbers<[1], [0], [0], [1], [0, 0, 1, 1], [], []>} : vector<8x64xf32>, vector<64x16xf32>, vector<8x16xf32> -> vector<8x16xf32>
    %14 = vector.broadcast %4 : vector<1x16xf32> to vector<8x16xf32>
    %15 = arith.addf %13, %14 : vector<8x16xf32>
    %c0_12 = arith.constant 0 : index
    %c0_13 = arith.constant 0 : index
    %16 = vector.load %arg6[%c0_12, %c0_13] : memref<8x16xf32, #tpu.memory_space<vmem>>, vector<8x16xf32>
    tpu.vector_store %arg6[%c0_12, %c0_13], %15 {strides = array<i32>} : memref<8x16xf32, #tpu.memory_space<vmem>>, vector<8x16xf32>,
    %cst_14 = arith.constant dense<0xFF800000> : vector<8xf32>
    %17 = vector.multi_reduction <maximumf>, %15, %cst_14 [1] : vector<8x16xf32> to vector<8xf32>
    %18 = vector.shape_cast %17 : vector<8xf32> to vector<8x1xf32>
    %19 = vector.broadcast %18 : vector<8x1xf32> to vector<8x16xf32>
    %20 = arith.subf %15, %19 : vector<8x16xf32>
    %21 = math.exp %20 : vector<8x16xf32>
    %cst_15 = arith.constant dense<0.000000e+00> : vector<8xf32>
    %22 = vector.multi_reduction <add>, %21, %cst_15 [1] : vector<8x16xf32> to vector<8xf32>
    %23 = vector.shape_cast %22 : vector<8xf32> to vector<8x1xf32>
    %24 = tpu.reciprocal %23 {approx = true} : vector<8x1xf32> -> vector<8x1xf32>
    %25 = arith.mulf %23, %24 : vector<8x1xf32>
    %cst_16 = arith.constant 2.000000e+00 : f32
    %26 = vector.broadcast %cst_16 : f32 to vector<8x1xf32>
    %27 = arith.subf %26, %25 : vector<8x1xf32>
    %28 = arith.mulf %24, %27 : vector<8x1xf32>
    %29 = vector.broadcast %28 : vector<8x1xf32> to vector<8x16xf32>
    %30 = arith.mulf %21, %29 : vector<8x16xf32>
    %c0_17 = arith.constant 0 : index
    %c0_18 = arith.constant 0 : index
    %31 = vector.load %arg7[%c0_17, %c0_18] : memref<8x16xf32, #tpu.memory_space<vmem>>, vector<8x16xf32>
    tpu.vector_store %arg7[%c0_17, %c0_18], %30 {strides = array<i32>} : memref<8x16xf32, #tpu.memory_space<vmem>>, vector<8x16xf32>,
    return
  }
  func.func @transform_0(%arg0: i32) -> (i32, i32) {
    %c0_i32 = arith.constant 0 : i32
    %c0_i32_0 = arith.constant 0 : i32
    return %arg0, %c0_i32 : i32, i32
  }
  func.func @transform_1(%arg0: i32) -> (i32, i32) {
    %c0_i32 = arith.constant 0 : i32
    %c0_i32_0 = arith.constant 0 : i32
    %c0_i32_1 = arith.constant 0 : i32
    return %c0_i32, %c0_i32_0 : i32, i32
  }
  func.func @transform_2(%arg0: i32) -> (i32, i32) {
    %c0_i32 = arith.constant 0 : i32
    %c0_i32_0 = arith.constant 0 : i32
    %c0_i32_1 = arith.constant 0 : i32
    return %c0_i32, %c0_i32_0 : i32, i32
  }
  func.func @transform_3(%arg0: i32) -> (i32, i32) {
    %c0_i32 = arith.constant 0 : i32
    %c0_i32_0 = arith.constant 0 : i32
    %c0_i32_1 = arith.constant 0 : i32
    return %c0_i32, %c0_i32_0 : i32, i32
  }
  func.func @transform_4(%arg0: i32) -> (i32, i32) {
    %c0_i32 = arith.constant 0 : i32
    %c0_i32_0 = arith.constant 0 : i32
    %c0_i32_1 = arith.constant 0 : i32
    return %c0_i32, %c0_i32_0 : i32, i32
  }
  func.func @transform_5(%arg0: i32) -> (i32, i32) {
    %c0_i32 = arith.constant 0 : i32
    %c0_i32_0 = arith.constant 0 : i32
    return %arg0, %c0_i32 : i32, i32
  }
  func.func @transform_6(%arg0: i32) -> (i32, i32) {
    %c0_i32 = arith.constant 0 : i32
    %c0_i32_0 = arith.constant 0 : i32
    return %arg0, %c0_i32 : i32, i32
  }
}

</mosaic_0001>

<bundles_post_ra>
// kernel: pdense_forward.1
= control target key start
LH: loop header
LB: loop body
LE: loop exit
PB: predicated region body
PF: predicated region fallthrough
CT: control target
= control target key end

     0   :  { %12 = vsyncpa [#allocation3], 0  ;;  %v370_v3 = vmov 0.0|0.0   ;;  %vm371_vm0 = vmmov 0   ;;  %v372_v6 = vmov 0.0   ;;  %s483_s0 = inlined_call_operand.vmem [shape: f32[8,32], index: 0, kind: input, shape index: {}]   ;;  %s484_s1 = inlined_call_operand.vmem [shape: f32[32,64], index: 1, kind: input, shape index: {}]   ;;  %s485_s2 = inlined_call_operand.vmem [shape: f32[1,64], index: 2, kind: input, shape index: {}]   ;;  %s486_s3 = inlined_call_operand.vmem [shape: f32[64,16], index: 3, kind: input, shape index: {}]   ;;  %s487_s4 = inlined_call_operand.vmem [shape: f32[1,16], index: 4, kind: input, shape index: {}]   ;;  %s488_s5 = inlined_call_operand.hbm [shape: f32[8,16], index: 5, kind: output, shape index: {0}]   ;;  %s489_s6 = inlined_call_operand.hbm [shape: f32[8,16], index: 6, kind: output, shape index: {1}]  }
   0x1   :  { %v25_v0 = vld [vmem:[%s484_s1] sm:$0xff]  ;;  %v26_v1 = vld [vmem:[%s484_s1 + $0x8] sm:$0xff]  ;;  %v27_v2 = vld [vmem:[%s484_s1 + $0x10] sm:$0xff]  ;;  %295 = vmatprep.subr.bf16.mxu0 %v370_v3  ;;  %273 = vmatprep.mubr.msk.f32.mxu0 %vm371_vm0, %v372_v6 }
   0x2   :  { %v296_v4 = vpack.c.bf16 %v26_v1, %v25_v0  ;;  %v28_v5 = vld [vmem:[%s484_s1 + $0x18] sm:$0xff]  ;;  %v29_v7 = vld [vmem:[%s486_s3] sm:$0xff]  ;;  %301 = vmatprep.subr.bf16.mxu1 %v370_v3  ;;  %v30_v8 = vld [vmem:[%s486_s3 + $0x8] sm:$0xff]  ;;  %292 = vmatprep.mubr.msk.f32.mxu1 %vm371_vm0, %v372_v6 }
   0x3   :  { %v31_v9 = vld [vmem:[%s486_s3 + $0x10] sm:$0xff]  ;;  %v32_v10 = vld [vmem:[%s486_s3 + $0x18] sm:$0xff]  ;;  %v299_v11 = vpack.c.bf16 %v28_v5, %v27_v2  ;;  %v302_v12 = vpack.c.bf16 %v30_v8, %v29_v7 }
   0x4   :  { %297 = vmatpush3.bf16.msra.mxu0 %v296_v4 }
   0x5   :  { %298 = vmatprep.subr.bf16.mxu0 %v370_v3 }
   0x6   :  { %13 = vsyncpa [#allocation5], 0  ;;  %303 = vmatpush3.bf16.msra.mxu1 %v302_v12  ;;  %v305_v13 = vpack.c.bf16 %v32_v10, %v31_v9  ;;  %v33_v14 = vld [vmem:[%s486_s3 + $0x20] sm:$0xff]  ;;  %v34_v15 = vld [vmem:[%s486_s3 + $0x28] sm:$0xff]  ;;  %vm45_vm1 = vcmask 261120   ;;  %vm128_vm3 = vcmask 523264  }
   0x7   :  { %304 = vmatprep.subr.bf16.mxu1 %v370_v3  ;;  %v24_v16 = vld [vmem:[%s483_s0] sm:$0xff]  ;;  %v308_v17 = vpack.c.bf16 %v34_v15, %v33_v14  ;;  %v35_v18 = vld [vmem:[%s486_s3 + $0x30] sm:$0xff]  ;;  %v36_v19 = vld [vmem:[%s486_s3 + $0x38] sm:$0xff]  ;;  %vm202_vm4 = vcmask 130048  }
   0x8   :  { %300 = vmatpush3.bf16.msra.mxu0 %v299_v11  ;;  %v311_v20 = vpack.c.bf16 %v36_v19, %v35_v18  ;;  %v247_v21 = vld [vmem:[%s485_s2] ss:$0 sm:$0xff]  ;;  %s373_s2 = smov [#allocation2]  }
   0x9   :  { %v249_v27 = vld [vmem:[%s487_s4] ss:$0 sm:$0xff]  ;;  %s225_s3 = sshll.u32 %s373_s2, 4  ;;  %s226_s3 = int_to_ptr.vmem [resolvable:$true] %s225_s3 }
   0xa   :  { %306 = vmatpush3.bf16.msra.mxu1 %v305_v13  ;;  %s322_s4 = scalar_lea.vmem %s226_s3, 128  ;;  %p327_p1 = scmp.lt.s32.totalorder %s226_s3, %s226_s3 }
   0xb   :  { %274 = vmatmul.mubr.msk.f32.vlgmr.msra.gmra.mrb[0].mxu0 %vm45_vm1, %v24_v16  ;;  %307 = vmatprep.subr.bf16.mxu1 %v370_v3  ;;  %p323_p0 = scmp.ne.s32.totalorder %s226_s3, %s322_s4  ;;  %p328_p2 = scmp.lt.s32.totalorder %s322_s4, %s322_s4 }
   0xd   :  { %p329_p3 = por %p328_p2, %p327_p1 }
   0xe   :  { %309 = vmatpush3.bf16.msra.mxu1 %v308_v17 }
   0xf   :  { %310 = vmatprep.subr.bf16.mxu1 %v370_v3  ;;  %p330_p4 = pnand %p329_p3, %p323_p0 }
  0x12   :  { %312 = vmatpush3.bf16.msra.mxu1 %v311_v20 }
  0xde   :  { %v115_v22 = vpop.f32.mrb[0].mxu0 }
  0xdf   :  { %v116_v23 = vadd.f32 %v247_v21, %v115_v22  ;;  %v275_v24 = vpop.f32.mrb[1].mxu0 }
  0xe1   :  { %vm119_vm2 = vcmp.gt.f32.partialorder %v116_v23, 0.0  ;;  %v120_v25 = vmul.f32 0.2, %v116_v23 }
  0xe3   :  { %v121_v26 = vsel %vm119_vm2, %v116_v23, %v120_v25 }
  0xe4   :  { %293 = vmatmul.mubr.msk.f32.vlgmr.msra.gmra.mrb[0].mxu1 %vm128_vm3, %v121_v26 }
 0x1b7   :  { %v198_v28 = vpop.f32.mrb[0].mxu1 }
 0x1b8   :  { %v199_v29 = vadd.f32 %v249_v27, %v198_v28  ;;  %v294_v30 = vpop.f32.mrb[1].mxu1 }
 0x1ba   :  { %v204_v31 = vsel %vm202_vm4, %v199_v29, -inf  ;;  %203 = vst.msk [vmem:[#allocation2] sm:$0xff] %vm202_vm4, %v199_v29 }
 0x1bb   :  { %205 = vmax.xlane.f32.xlu0 %v204_v31 }
 0x248   :  { %v206_v32 = vpop.xlane.xlu0 %205 }
 0x249   :  { %v207_v33 = vsub.f32 %v199_v29, %v206_v32 }
 0x24b   :  { %v208_v34 = vmul.f32 1.442695, %v207_v33 }
 0x24d   :  { %318 = vpow2.f32 %v208_v34 }
 0x257   :  { %v319_v35 = vpop.eup %318 }
 0x258   :  { %v210_v36 = vsel %vm202_vm4, %v319_v35, 0.0 }
 0x259   :  { %211 = vadd.xlane.f32.xlu0 %v210_v36 }
 0x25a   :  { %333 = shalt.err (!%p330_p4)
}
 0x25b   :  { %s334_s27 = scalar_lea.hbm %s488_s5, 128 }
 0x25c   :  { %p335_p5 = scmp.ne.s32.totalorder %s488_s5, %s334_s27  ;;  %p338_p6 = scmp.lt.u32.totalorder %s334_s27, %s488_s5 }
 0x25e   :  { %p340_p7 = pnand %p338_p6, %p335_p5 }
 0x260   :  { %343 = shalt.err (!%p340_p7)
}
 0x261   :  { %228 = dma.vmem_to_hbm [thread:$0]  %s226_s3, 128, %s488_s5, [#allocation3]  }
 0x262   :  { %s374_s10 = smov [#allocation4]  }
 0x263   :  { %s235_s11 = sshll.u32 %s374_s10, 4  ;;  %s236_s11 = int_to_ptr.vmem [resolvable:$true] %s235_s11 }
 0x264   :  { %s344_s12 = scalar_lea.vmem %s236_s11, 128  ;;  %p349_p9 = scmp.lt.s32.totalorder %s236_s11, %s236_s11 }
 0x265   :  { %p345_p8 = scmp.ne.s32.totalorder %s236_s11, %s344_s12  ;;  %p350_p10 = scmp.lt.s32.totalorder %s344_s12, %s344_s12 }
 0x267   :  { %p351_p11 = por %p350_p10, %p349_p9 }
 0x269   :  { %p352_p12 = pnand %p351_p11, %p345_p8 }
 0x2e6   :  { %v212_v37 = vpop.xlane.xlu0 %211 }
 0x2e7   :  { %320 = vrcp.f32 %v212_v37 }
 0x2f1   :  { %v321_v38 = vpop.eup %320 }
 0x2f2   :  { %v214_v39 = vmul.f32 %v321_v38, %v212_v37 }
 0x2f4   :  { %v215_v40 = vsub.f32 2.0, %v214_v39 }
 0x2f6   :  { %v216_v41 = vmul.f32 %v321_v38, %v215_v40 }
 0x2f8   :  { %v217_v42 = vmul.f32 %v319_v35, %v216_v41 }
 0x2fa   :  { %218 = vst.msk [vmem:[#allocation4] sm:$0xff] %vm202_vm4, %v217_v42 }
 0x2fb   :  { %355 = shalt.err (!%p352_p12)
}
 0x2fc   :  { %s356_s13 = scalar_lea.hbm %s489_s6, 128 }
 0x2fd   :  { %p357_p13 = scmp.ne.s32.totalorder %s489_s6, %s356_s13  ;;  %p360_p0 = scmp.lt.u32.totalorder %s356_s13, %s489_s6 }
 0x2ff   :  { %p362_p1 = pnand %p360_p0, %p357_p13 }
 0x301   :  { %365 = shalt.err (!%p362_p1)
}
 0x302   :  { %238 = dma.vmem_to_hbm [thread:$0]  %s236_s11, 128, %s489_s6, [#allocation5]  }
 0x303   :  { %366 = dma.done.wait [#allocation3], 128  }
 0x304   :  { %367 = vsyncadd [#allocation3], 4294967168 }
 0x305   :  { %368 = dma.done.wait [#allocation5], 128  }
 0x306   :  { %369 = vsyncadd [#allocation5], 4294967168 }
 0x307   :  { %245 = vsyncpa [#allocation3], 1 }
 0x308   :  { %246 = vsyncpa [#allocation5], 1 }

</bundles_post_ra>
